<compile_context>
chip_gen: v6e
topology: v6e:2x2x1
jax: 0.10.0
libtpu: 0.0.40
codegen_flags: <defaults>
</compile_context>

<pallas_src>
import functools

import numpy as np
import jax
import jax.numpy as jnp
from jax import lax
from jax.experimental import pallas as pl
from jax.experimental.pallas import tpu as pltpu


def _label_smooth_loss_kernel(pred_ref, sim_ref, adj_ref, nadj_ref, prob_ref,
                              out_ref, ss_ref, *, l_orig, tl,
                              predict_gap, relation_gap):
    j = pl.program_id(0)

    @pl.when(j == 0)
    def _():
        ss_ref[...] = jnp.zeros_like(ss_ref)

    P = pred_ref[...]                      # (Bp, Lp) full (padded) predicts
    S = sim_ref[...]                       # (Bp, Bp)
    A = adj_ref[...]                       # (Lp, TL)  lj tile of adjList
    N = nadj_ref[...]                      # (Lp, TL)  lj tile of negAdjList
    prob = prob_ref[...]                   # (1, TL)   lj tile of label_prob_vec

    Bp, Lp = P.shape

    exists_lb = 0.5 + predict_gap
    miss_ub = 0.5 - predict_gap

    # ---- (Bp, Lp) li-side masks on predicts (li lives on the lane axis). ----
    lane = lax.broadcasted_iota(jnp.int32, (Bp, Lp), 1)
    li_valid = lane < l_orig                                     # padded li -> 0
    exists = jnp.logical_and(li_valid, P > exists_lb)
    miss = jnp.logical_and(
        li_valid,
        jnp.logical_and(jnp.logical_not(P > exists_lb), P < miss_ub))
    zero_bl = jnp.zeros_like(P)
    # K-stacked LHS (Bp, 4*Lp): [E*P | E*(1-P) | M*(1-P) | M*P]
    lhs = jnp.concatenate(
        [jnp.where(exists, P, zero_bl),
         jnp.where(exists, 1.0 - P, zero_bl),
         jnp.where(miss, 1.0 - P, zero_bl),
         jnp.where(miss, P, zero_bl)], axis=1)

    # ---- (Lp, TL) (li, lj)-side masks on adj/negAdj for this lj tile. ----
    incr = prob + relation_gap             # (1, TL) broadcasts over li rows
    decr = prob - relation_gap
    li = lax.broadcasted_iota(jnp.int32, (Lp, tl), 0)
    lj = lax.broadcasted_iota(jnp.int32, (Lp, tl), 1) + j * tl
    pair_ok = jnp.logical_and(li != lj, lj < l_orig)             # off-diag, real lj

    a_gt = A > incr
    a_decr = jnp.logical_and(
        jnp.logical_and(A < decr, jnp.logical_not(a_gt)), pair_ok)
    a_any = jnp.logical_and(jnp.logical_or(a_gt, a_decr), pair_ok)  # incr|decr
    n_gt = N > incr
    n_decr = jnp.logical_and(
        jnp.logical_and(N < decr, jnp.logical_not(n_gt)), pair_ok)
    n_any = jnp.logical_and(jnp.logical_or(n_gt, n_decr), pair_ok)

    zero_lt = jnp.zeros_like(A)
    one_lt = jnp.ones_like(A)
    # K-stacked RHS (4*Lp, TL), block order matches the LHS blocks.
    rhs = jnp.concatenate(
        [jnp.where(a_any, A, zero_lt),          # pairs with E*P
         jnp.where(a_decr, one_lt, zero_lt),    # pairs with E*(1-P)
         jnp.where(n_any, N, zero_lt),          # pairs with M*(1-P)
         jnp.where(n_decr, one_lt, zero_lt)],   # pairs with M*P
        axis=0)

    # Diagonal contribution (li == lj) is simply + predicts[:, lj tile].
    start = pl.multiple_of(j * tl, tl)
    p_tile = pred_ref[:, pl.ds(start, tl)]                       # (Bp, TL)

    cand = (p_tile + jnp.dot(lhs, rhs, preferred_element_type=jnp.float32)
            ) * (1.0 / l_orig)

    # Loss part for this lj tile: accumulate per-row sum of squared diffs.
    diff = p_tile - jnp.dot(S, cand, preferred_element_type=jnp.float32)
    ss_ref[...] += jnp.sum(diff * diff, axis=1, keepdims=True)

    @pl.when(j == pl.num_programs(0) - 1)
    def _():
        norms = jnp.sqrt(ss_ref[...])                            # (Bp, 1)
        row_sums = jnp.sum(S, axis=1, keepdims=True)             # (Bp, 1)
        valid = row_sums != 0.0                                  # padded rows sum 0
        cnt = jnp.sum(jnp.where(valid, 1.0, 0.0))
        total = jnp.sum(jnp.where(valid, norms, 0.0))
        out_ref[0, 0] = jnp.where(cnt == 0.0, 0.0, total / cnt)


def label_smooth_loss(predicts, similarities, adj_list, neg_adj_list,
                      label_prob_vec, predict_gap=0.0, relation_gap=0.0):
    predicts = jnp.asarray(predicts, jnp.float32)
    similarities = jnp.asarray(similarities, jnp.float32)
    adj_list = jnp.asarray(adj_list, jnp.float32)
    neg_adj_list = jnp.asarray(neg_adj_list, jnp.float32)
    B, L = predicts.shape
    prob_row = jnp.asarray(label_prob_vec, jnp.float32).reshape(1, L)

    # Pad labels to a multiple of 128 (lane-dense vregs / clean MXU K) and the
    # batch to a multiple of 8.  Zero padding keeps padded rows/cols inert
    # (enforced in-kernel via li/lj validity masks and the S row-sum check).
    Lp = max(128, ((L + 127) // 128) * 128)
    Bp = max(8, ((B + 7) // 8) * 8)
    pred_p = jnp.pad(predicts, ((0, Bp - B), (0, Lp - L)))
    sim_p = jnp.pad(similarities, ((0, Bp - B), (0, Bp - B)))
    adj_p = jnp.pad(adj_list, ((0, Lp - L), (0, Lp - L)))
    nadj_p = jnp.pad(neg_adj_list, ((0, Lp - L), (0, Lp - L)))
    prob_p = jnp.pad(prob_row, ((0, 0), (0, Lp - L)))

    # lj tile width: lane-dense, bounded VMEM even for large L (fits v7x 64MiB).
    TL = 256 if (Lp % 256 == 0) else 128
    num_tiles = Lp // TL

    # Working-set estimate; raise the scoped VMEM limit only if needed.
    est = (2 * 2 * Lp * TL            # double-buffered A / negA tiles
           + 2 * Bp * Lp + 2 * Bp * Bp
           + 12 * Lp * TL + 6 * Bp * Lp) * 4
    ckw = dict(dimension_semantics=("arbitrary",))
    if est > 32 * 1024 * 1024:
        ckw["vmem_limit_bytes"] = min(int(est), 100 * 1024 * 1024)
    compiler_params = pltpu.CompilerParams(**ckw)

    kernel = functools.partial(_label_smooth_loss_kernel,
                               l_orig=int(L), tl=int(TL),
                               predict_gap=float(predict_gap),
                               relation_gap=float(relation_gap))
    out = pl.pallas_call(
        kernel,
        out_shape=jax.ShapeDtypeStruct((1, 1), jnp.float32),
        grid=(num_tiles,),
        in_specs=[
            pl.BlockSpec((Bp, Lp), lambda j: (0, 0)),   # predicts (resident)
            pl.BlockSpec((Bp, Bp), lambda j: (0, 0)),   # similarities (resident)
            pl.BlockSpec((Lp, TL), lambda j: (0, j)),   # adjList lj tile
            pl.BlockSpec((Lp, TL), lambda j: (0, j)),   # negAdjList lj tile
            pl.BlockSpec((1, TL), lambda j: (0, j)),    # label_prob_vec lj tile
        ],
        out_specs=pl.BlockSpec(memory_space=pltpu.MemorySpace.SMEM),
        scratch_shapes=[pltpu.VMEM((Bp, 1), jnp.float32)],   # per-row sum(diff^2)
        compiler_params=compiler_params,
    )(pred_p, sim_p, adj_p, nadj_p, prob_p)
    return out[0, 0]


def _reference(P, S, A, N, prob, pg, rg):
    """Literal numpy port of the torch loops (float64)."""
    P = P.astype(np.float64); S = S.astype(np.float64)
    A = A.astype(np.float64); N = N.astype(np.float64)
    prob = prob.astype(np.float64)
    B, L = P.shape
    cand = np.zeros((B, L), np.float64)
    elb, mub = 0.5 + pg, 0.5 - pg
    for b in range(B):
        for lj in range(L):
            incr, decr = prob[lj] + rg, prob[lj] - rg
            s = 0.0
            for li in range(L):
                if li == lj:
                    s += P[b, li]
                    continue
                if P[b, li] > elb:
                    a = A[li, lj]
                    if a > incr:
                        s += P[b, li] * a
                    elif a < decr:
                        s += 1.0 - P[b, li] * (1.0 - a)
                elif P[b, li] < mub:
                    a = N[li, lj]
                    if a > incr:
                        s += (1.0 - P[b, li]) * a
                    elif a < decr:
                        s += 1.0 - (1.0 - P[b, li]) * (1.0 - a)
            cand[b, lj] = s / L
    total, cnt = 0.0, 0
    for i in range(B):
        if S[i].sum() == 0:
            continue
        cnt += 1
        total += np.linalg.norm(P[i] - S[i] @ cand)
    return 0.0 if cnt == 0 else total / cnt


if __name__ == "__main__":
    B, L = 8, 16
    key = jax.random.PRNGKey(0)
    k1, k2, k3, k4, k5 = jax.random.split(key, 5)

    predicts = jax.nn.sigmoid(jax.random.normal(k1, (B, L), jnp.float32))
    similarities = jax.random.uniform(k2, (B, B), jnp.float32)
    similarities = similarities.at[0].set(0.0)   # exercise the "skip row" path
    adj_list = jax.random.uniform(k3, (L, L), jnp.float32)
    neg_adj_list = jax.random.uniform(k4, (L, L), jnp.float32)
    label_prob_vec = jax.random.uniform(k5, (L,), jnp.float32,
                                        minval=0.05, maxval=0.6)
    predict_gap, relation_gap = 0.1, 0.05

    loss = label_smooth_loss(predicts, similarities, adj_list, neg_adj_list,
                             label_prob_vec, predict_gap, relation_gap)
    loss = jax.block_until_ready(loss)

    ref = _reference(np.asarray(predicts), np.asarray(similarities),
                     np.asarray(adj_list), np.asarray(neg_adj_list),
                     np.asarray(label_prob_vec), predict_gap, relation_gap)
    assert abs(float(loss) - ref) <= 1e-3 * max(1.0, abs(ref)), (float(loss), ref)
    print("KERNEL_OK")
</pallas_src>

<mosaic_0001>
module attributes {stable_mosaic.version = 11 : i64} {
  func.func @_label_smooth_loss_kernel(%arg0: i32, %arg1: memref<8x128xf32, #tpu.memory_space<vmem>>, %arg2: memref<8x8xf32, #tpu.memory_space<vmem>>, %arg3: memref<128x128xf32, #tpu.memory_space<vmem>>, %arg4: memref<128x128xf32, #tpu.memory_space<vmem>>, %arg5: memref<1x128xf32, #tpu.memory_space<vmem>>, %arg6: memref<1x1xf32, #tpu.memory_space<smem>>, %arg7: memref<8x1xf32, #tpu.memory_space<vmem>>) attributes {dimension_semantics = [#tpu.dimension_semantics<arbitrary>], iteration_bounds = array<i64: 1>, scalar_prefetch = 0 : i64, scratch_operands = 1 : i64, tpu.core_type = #tpu.core_type<tc>, window_params = [{pipeline_mode = #tpu.pipeline_mode<synchronous>, transform_indices = @transform_0, window_bounds = array<i64: 8, 128>}, {pipeline_mode = #tpu.pipeline_mode<synchronous>, transform_indices = @transform_1, window_bounds = array<i64: 8, 8>}, {transform_indices = @transform_2, window_bounds = array<i64: 128, 128>}, {transform_indices = @transform_3, window_bounds = array<i64: 128, 128>}, {transform_indices = @transform_4, window_bounds = array<i64: 1, 128>}, {transform_indices = @transform_5, window_bounds = array<i64: 1, 1>}]} {
    %c0_i32 = arith.constant 0 : i32
    %0 = arith.cmpi eq, %arg0, %c0_i32 : i32
    %1 = arith.extui %0 : i1 to i32
    %c0_i32_0 = arith.constant 0 : i32
    %2 = arith.cmpi ne, %1, %c0_i32_0 : i32
    scf.if %2 {
      %cst_35 = arith.constant 0.000000e+00 : f32
      %88 = vector.broadcast %cst_35 : f32 to vector<8x1xf32>
      %c0_36 = arith.constant 0 : index
      %c0_37 = arith.constant 0 : index
      %89 = vector.load %arg7[%c0_36, %c0_37] : memref<8x1xf32, #tpu.memory_space<vmem>>, vector<8x1xf32>
      tpu.vector_store %arg7[%c0_36, %c0_37], %88 {strides = array<i32>} : memref<8x1xf32, #tpu.memory_space<vmem>>, vector<8x1xf32>,
    } else {
    }
    %c0 = arith.constant 0 : index
    %c0_1 = arith.constant 0 : index
    %3 = vector.load %arg1[%c0, %c0_1] : memref<8x128xf32, #tpu.memory_space<vmem>>, vector<8x128xf32>
    %c0_2 = arith.constant 0 : index
    %c0_3 = arith.constant 0 : index
    %4 = vector.load %arg2[%c0_2, %c0_3] : memref<8x8xf32, #tpu.memory_space<vmem>>, vector<8x8xf32>
    %c0_4 = arith.constant 0 : index
    %c0_5 = arith.constant 0 : index
    %5 = vector.load %arg3[%c0_4, %c0_5] : memref<128x128xf32, #tpu.memory_space<vmem>>, vector<128x128xf32>
    %c0_6 = arith.constant 0 : index
    %c0_7 = arith.constant 0 : index
    %6 = vector.load %arg4[%c0_6, %c0_7] : memref<128x128xf32, #tpu.memory_space<vmem>>, vector<128x128xf32>
    %c0_8 = arith.constant 0 : index
    %c0_9 = arith.constant 0 : index
    %7 = vector.load %arg5[%c0_8, %c0_9] : memref<1x128xf32, #tpu.memory_space<vmem>>, vector<1x128xf32>
    %8 = tpu.iota {dimensions = array<i32: 1>} : vector<8x128xi32>
    %c16_i32 = arith.constant 16 : i32
    %9 = vector.broadcast %c16_i32 : i32 to vector<8x128xi32>
    %10 = arith.cmpi slt, %8, %9 : vector<8x128xi32>
    %cst = arith.constant 6.000000e-01 : f32
    %11 = vector.broadcast %cst : f32 to vector<8x128xf32>
    %12 = arith.cmpf ogt, %3, %11 : vector<8x128xf32>
    %13 = arith.andi %10, %12 : vector<8x128xi1>
    %cst_10 = arith.constant 6.000000e-01 : f32
    %14 = vector.broadcast %cst_10 : f32 to vector<8x128xf32>
    %15 = arith.cmpf ogt, %3, %14 : vector<8x128xf32>
    %cst_11 = arith.constant dense<true> : vector<8x128xi1>
    %16 = arith.xori %15, %cst_11 : vector<8x128xi1>
    %cst_12 = arith.constant 4.000000e-01 : f32
    %17 = vector.broadcast %cst_12 : f32 to vector<8x128xf32>
    %18 = arith.cmpf olt, %3, %17 : vector<8x128xf32>
    %19 = arith.andi %16, %18 : vector<8x128xi1>
    %20 = arith.andi %10, %19 : vector<8x128xi1>
    %cst_13 = arith.constant 0.000000e+00 : f32
    %21 = vector.broadcast %cst_13 : f32 to vector<8x128xf32>
    %22 = arith.select %13, %3, %21 : vector<8x128xi1>, vector<8x128xf32>
    %cst_14 = arith.constant 1.000000e+00 : f32
    %23 = vector.broadcast %cst_14 : f32 to vector<8x128xf32>
    %24 = arith.subf %23, %3 : vector<8x128xf32>
    %25 = arith.select %13, %24, %21 : vector<8x128xi1>, vector<8x128xf32>
    %cst_15 = arith.constant 1.000000e+00 : f32
    %26 = vector.broadcast %cst_15 : f32 to vector<8x128xf32>
    %27 = arith.subf %26, %3 : vector<8x128xf32>
    %28 = arith.select %20, %27, %21 : vector<8x128xi1>, vector<8x128xf32>
    %29 = arith.select %20, %3, %21 : vector<8x128xi1>, vector<8x128xf32>
    %30 = tpu.concatenate %22, %25, %28, %29 in 1 : vector<8x128xf32>, vector<8x128xf32>, vector<8x128xf32>, vector<8x128xf32> -> vector<8x512xf32>
    %cst_16 = arith.constant 5.000000e-02 : f32
    %31 = vector.broadcast %cst_16 : f32 to vector<1x128xf32>
    %32 = arith.addf %7, %31 : vector<1x128xf32>
    %cst_17 = arith.constant 5.000000e-02 : f32
    %33 = vector.broadcast %cst_17 : f32 to vector<1x128xf32>
    %34 = arith.subf %7, %33 : vector<1x128xf32>
    %35 = tpu.iota {dimensions = array<i32: 0>} : vector<128x128xi32>
    %36 = tpu.iota {dimensions = array<i32: 1>} : vector<128x128xi32>
    %c128_i32 = arith.constant 128 : i32
    %37 = arith.muli %arg0, %c128_i32 : i32
    %38 = vector.broadcast %37 : i32 to vector<128x128xi32>
    %39 = arith.addi %36, %38 : vector<128x128xi32>
    %40 = arith.cmpi ne, %35, %39 : vector<128x128xi32>
    %c16_i32_18 = arith.constant 16 : i32
    %41 = vector.broadcast %c16_i32_18 : i32 to vector<128x128xi32>
    %42 = arith.cmpi slt, %39, %41 : vector<128x128xi32>
    %43 = arith.andi %40, %42 : vector<128x128xi1>
    %44 = vector.broadcast %32 : vector<1x128xf32> to vector<128x128xf32>
    %45 = arith.cmpf ogt, %5, %44 : vector<128x128xf32>
    %46 = vector.broadcast %34 : vector<1x128xf32> to vector<128x128xf32>
    %47 = arith.cmpf olt, %5, %46 : vector<128x128xf32>
    %cst_19 = arith.constant dense<true> : vector<128x128xi1>
    %48 = arith.xori %45, %cst_19 : vector<128x128xi1>
    %49 = arith.andi %47, %48 : vector<128x128xi1>
    %50 = arith.andi %49, %43 : vector<128x128xi1>
    %51 = arith.ori %45, %50 : vector<128x128xi1>
    %52 = arith.andi %51, %43 : vector<128x128xi1>
    %53 = vector.broadcast %32 : vector<1x128xf32> to vector<128x128xf32>
    %54 = arith.cmpf ogt, %6, %53 : vector<128x128xf32>
    %55 = vector.broadcast %34 : vector<1x128xf32> to vector<128x128xf32>
    %56 = arith.cmpf olt, %6, %55 : vector<128x128xf32>
    %cst_20 = arith.constant dense<true> : vector<128x128xi1>
    %57 = arith.xori %54, %cst_20 : vector<128x128xi1>
    %58 = arith.andi %56, %57 : vector<128x128xi1>
    %59 = arith.andi %58, %43 : vector<128x128xi1>
    %60 = arith.ori %54, %59 : vector<128x128xi1>
    %61 = arith.andi %60, %43 : vector<128x128xi1>
    %cst_21 = arith.constant 0.000000e+00 : f32
    %62 = vector.broadcast %cst_21 : f32 to vector<128x128xf32>
    %cst_22 = arith.constant 1.000000e+00 : f32
    %63 = vector.broadcast %cst_22 : f32 to vector<128x128xf32>
    %64 = arith.select %52, %5, %62 : vector<128x128xi1>, vector<128x128xf32>
    %65 = arith.select %50, %63, %62 : vector<128x128xi1>, vector<128x128xf32>
    %66 = arith.select %61, %6, %62 : vector<128x128xi1>, vector<128x128xf32>
    %67 = arith.select %59, %63, %62 : vector<128x128xi1>, vector<128x128xf32>
    %68 = tpu.concatenate %64, %65, %66, %67 in 0 : vector<128x128xf32>, vector<128x128xf32>, vector<128x128xf32>, vector<128x128xf32> -> vector<512x128xf32>
    %c128_i32_23 = arith.constant 128 : i32
    %69 = arith.muli %arg0, %c128_i32_23 : i32
    %70 = tpu.assume_multiple %69, 128 : i32
    %c0_24 = arith.constant 0 : index
    %71 = arith.index_cast %70 : i32 to index
    %72 = vector.load %arg1[%c0_24, %71] : memref<8x128xf32, #tpu.memory_space<vmem>>, vector<8x128xf32>
    %cst_25 = arith.constant dense<0.000000e+00> : vector<8x128xf32>
    %73 = tpu.matmul %30, %68, %cst_25 {dimension_numbers = #tpu.dot_dimension_numbers<[1], [0], [0], [1], [0, 0, 1, 1], [], []>} : vector<8x512xf32>, vector<512x128xf32>, vector<8x128xf32> -> vector<8x128xf32>
    %74 = arith.addf %72, %73 : vector<8x128xf32>
    %cst_26 = arith.constant 6.250000e-02 : f32
    %75 = vector.broadcast %cst_26 : f32 to vector<8x128xf32>
    %76 = arith.mulf %74, %75 : vector<8x128xf32>
    %cst_27 = arith.constant dense<0.000000e+00> : vector<8x128xf32>
    %77 = tpu.matmul %4, %76, %cst_27 {dimension_numbers = #tpu.dot_dimension_numbers<[1], [0], [0], [1], [0, 0, 1, 1], [], []>} : vector<8x8xf32>, vector<8x128xf32>, vector<8x128xf32> -> vector<8x128xf32>
    %78 = arith.subf %72, %77 : vector<8x128xf32>
    %c0_28 = arith.constant 0 : index
    %c0_29 = arith.constant 0 : index
    %79 = vector.load %arg7[%c0_28, %c0_29] : memref<8x1xf32, #tpu.memory_space<vmem>>, vector<8x1xf32>
    %80 = arith.mulf %78, %78 : vector<8x128xf32>
    %cst_30 = arith.constant dense<0.000000e+00> : vector<8xf32>
    %81 = vector.multi_reduction <add>, %80, %cst_30 [1] : vector<8x128xf32> to vector<8xf32>
    %82 = vector.shape_cast %81 : vector<8xf32> to vector<8x1xf32>
    %83 = arith.addf %79, %82 : vector<8x1xf32>
    %c0_31 = arith.constant 0 : index
    %c0_32 = arith.constant 0 : index
    %84 = vector.load %arg7[%c0_31, %c0_32] : memref<8x1xf32, #tpu.memory_space<vmem>>, vector<8x1xf32>
    tpu.vector_store %arg7[%c0_31, %c0_32], %83 {strides = array<i32>} : memref<8x1xf32, #tpu.memory_space<vmem>>, vector<8x1xf32>,
    %c0_i32_33 = arith.constant 0 : i32
    %85 = arith.cmpi eq, %arg0, %c0_i32_33 : i32
    %86 = arith.extui %85 : i1 to i32
    %c0_i32_34 = arith.constant 0 : i32
    %87 = arith.cmpi ne, %86, %c0_i32_34 : i32
    scf.if %87 {
      %c0_35 = arith.constant 0 : index
      %c0_36 = arith.constant 0 : index
      %88 = vector.load %arg7[%c0_35, %c0_36] : memref<8x1xf32, #tpu.memory_space<vmem>>, vector<8x1xf32>
      %89 = math.sqrt %88 : vector<8x1xf32>
      %cst_37 = arith.constant dense<0.000000e+00> : vector<8xf32>
      %90 = vector.multi_reduction <add>, %4, %cst_37 [1] : vector<8x8xf32> to vector<8xf32>
      %91 = vector.shape_cast %90 : vector<8xf32> to vector<8x1xf32>
      %cst_38 = arith.constant 0.000000e+00 : f32
      %92 = vector.broadcast %cst_38 : f32 to vector<8x1xf32>
      %93 = arith.cmpf one, %91, %92 : vector<8x1xf32>
      %cst_39 = arith.constant 1.000000e+00 : f32
      %cst_40 = arith.constant 0.000000e+00 : f32
      %94 = vector.broadcast %cst_39 : f32 to vector<8x1xf32>
      %95 = vector.broadcast %cst_40 : f32 to vector<8x1xf32>
      %96 = arith.select %93, %94, %95 : vector<8x1xi1>, vector<8x1xf32>
      %97 = vector.shape_cast %96 : vector<8x1xf32> to vector<1x8x1xf32>
      %cst_41 = arith.constant dense<0.000000e+00> : vector<1xf32>
      %98 = vector.multi_reduction <add>, %97, %cst_41 [1, 2] : vector<1x8x1xf32> to vector<1xf32>
      %99 = vector.shape_cast %98 : vector<1xf32> to vector<1x1x1xf32>
      %100 = vector.extract %99[0, 0, 0] : f32 from vector<1x1x1xf32>
      %cst_42 = arith.constant 0.000000e+00 : f32
      %101 = vector.broadcast %cst_42 : f32 to vector<8x1xf32>
      %102 = arith.select %93, %89, %101 : vector<8x1xi1>, vector<8x1xf32>
      %103 = vector.shape_cast %102 : vector<8x1xf32> to vector<1x8x1xf32>
      %cst_43 = arith.constant dense<0.000000e+00> : vector<1xf32>
      %104 = vector.multi_reduction <add>, %103, %cst_43 [1, 2] : vector<1x8x1xf32> to vector<1xf32>
      %105 = vector.shape_cast %104 : vector<1xf32> to vector<1x1x1xf32>
      %106 = vector.extract %105[0, 0, 0] : f32 from vector<1x1x1xf32>
      %cst_44 = arith.constant 0.000000e+00 : f32
      %107 = arith.cmpf oeq, %100, %cst_44 : f32
      %108 = arith.divf %106, %100 : f32
      %cst_45 = arith.constant 0.000000e+00 : f32
      %109 = arith.select %107, %cst_45, %108 : f32
      %c0_46 = arith.constant 0 : index
      %c0_47 = arith.constant 0 : index
      %110 = memref.load %arg6[%c0_46, %c0_47] : memref<1x1xf32, #tpu.memory_space<smem>>
      memref.store %109, %arg6[%c0_46, %c0_47] : memref<1x1xf32, #tpu.memory_space<smem>>
    } else {
    }
    return
  }
  func.func @transform_0(%arg0: i32) -> (i32, i32) {
    %c0_i32 = arith.constant 0 : i32
    %c0_i32_0 = arith.constant 0 : i32
    %c0_i32_1 = arith.constant 0 : i32
    return %c0_i32, %c0_i32_0 : i32, i32
  }
  func.func @transform_1(%arg0: i32) -> (i32, i32) {
    %c0_i32 = arith.constant 0 : i32
    %c0_i32_0 = arith.constant 0 : i32
    %c0_i32_1 = arith.constant 0 : i32
    return %c0_i32, %c0_i32_0 : i32, i32
  }
  func.func @transform_2(%arg0: i32) -> (i32, i32) {
    %c0_i32 = arith.constant 0 : i32
    %c0_i32_0 = arith.constant 0 : i32
    return %c0_i32, %arg0 : i32, i32
  }
  func.func @transform_3(%arg0: i32) -> (i32, i32) {
    %c0_i32 = arith.constant 0 : i32
    %c0_i32_0 = arith.constant 0 : i32
    return %c0_i32, %arg0 : i32, i32
  }
  func.func @transform_4(%arg0: i32) -> (i32, i32) {
    %c0_i32 = arith.constant 0 : i32
    %c0_i32_0 = arith.constant 0 : i32
    return %c0_i32, %arg0 : i32, i32
  }
  func.func @transform_5(%arg0: i32) -> (i32, i32) {
    %c0_i32 = arith.constant 0 : i32
    %c0_i32_0 = arith.constant 0 : i32
    %c0_i32_1 = arith.constant 0 : i32
    return %c0_i32, %c0_i32_0 : i32, i32
  }
}

</mosaic_0001>

<bundles_post_ra>
// kernel: tpu_custom_call.1
= control target key start
LH: loop header
LB: loop body
LE: loop exit
PB: predicated region body
PF: predicated region fallthrough
CT: control target
= control target key end

     0   :  { %10 = vsyncpa [#allocation4], 0  ;;  %s1617_s0 = inlined_call_operand.hbm [shape: f32[8,128], index: 0, kind: input, shape index: {}]   ;;  %s1618_s1 = inlined_call_operand.hbm [shape: f32[8,8], index: 1, kind: input, shape index: {}]   ;;  %s1619_s2 = inlined_call_operand.hbm [shape: f32[128,128], index: 2, kind: input, shape index: {}]   ;;  %s1620_s3 = inlined_call_operand.hbm [shape: f32[128,128], index: 3, kind: input, shape index: {}]   ;;  %s1621_s4 = inlined_call_operand.vmem [shape: f32[1,128], index: 4, kind: input, shape index: {}]   ;;  %s1622_s5 = inlined_call_operand.hbm [shape: f32[1,1], index: 5, kind: output, shape index: {}]  }
   0x1   :  { %11 = vsyncpa [#allocation7], 0 }
   0x2   :  { %12 = vsyncpa [#allocation10], 0 }
   0x3   :  { %13 = vsyncpa [#allocation5], 0  ;;  %s1004_s18 = smov [#allocation6]   ;;  %s1005_s20 = smov [#allocation3]  }
   0x4   :  { %s30_s19 = sshll.u32 %s1004_s18, 4  ;;  %s20_s21 = sshll.u32 %s1005_s20, 4  ;;  %s31_s19 = int_to_ptr.vmem [resolvable:$true] %s30_s19  ;;  %s21_s21 = int_to_ptr.vmem [resolvable:$true] %s20_s21 }
   0x5   :  { %s916_s22 = scalar_lea.vmem %s31_s19, 128  ;;  %p921_p1 = scmp.lt.s32.totalorder %s31_s19, %s31_s19 }
   0x6   :  { %p917_p0 = scmp.ne.s32.totalorder %s31_s19, %s916_s22  ;;  %p922_p2 = scmp.lt.s32.totalorder %s916_s22, %s916_s22 }
   0x8   :  { %p923_p3 = por %p922_p2, %p921_p1 }
   0xa   :  { %p924_p4 = pnand %p923_p3, %p917_p0 }
   0xc   :  { %927 = shalt.err (!%p924_p4)
}
   0xd   :  { %33 = dma.hbm_to_vmem [thread:$0]  %s1618_s1, 128, %s31_s19, [#allocation7]  }
   0xe   :  { %s936_s25 = scalar_lea.vmem %s21_s21, 128  ;;  %p941_p6 = scmp.lt.s32.totalorder %s21_s21, %s21_s21 }
   0xf   :  { %p937_p5 = scmp.ne.s32.totalorder %s21_s21, %s936_s25  ;;  %p942_p7 = scmp.lt.s32.totalorder %s936_s25, %s936_s25 }
  0x11   :  { %p943_p8 = por %p942_p7, %p941_p6 }
  0x13   :  { %p944_p9 = pnand %p943_p8, %p937_p5 }
  0x15   :  { %947 = shalt.err (!%p944_p9)
}
  0x16   :  { %23 = dma.hbm_to_vmem [thread:$0]  %s1617_s0, 128, %s21_s21, [#allocation4]  }
  0x17   :  { %s1006_s28 = smov [#allocation8]  }
  0x18   :  { %s39_s29 = sshll.u32 %s1006_s28, 4  ;;  %s40_s29 = int_to_ptr.vmem [resolvable:$true] %s39_s29 }
  0x19   :  { %s956_s30 = scalar_lea.vmem %s40_s29, 2048  ;;  %p961_p11 = scmp.lt.s32.totalorder %s40_s29, %s40_s29 }
  0x1a   :  { %p957_p10 = scmp.ne.s32.totalorder %s40_s29, %s956_s30  ;;  %p962_p12 = scmp.lt.s32.totalorder %s956_s30, %s956_s30 }
  0x1c   :  { %p963_p13 = por %p962_p12, %p961_p11 }
  0x1e   :  { %p964_p0 = pnand %p963_p13, %p957_p10 }
  0x20   :  { %967 = shalt.err (!%p964_p0)
}
  0x21   :  { %s1007_s1 = smov 128   ;;  %s1008_s6 = smov 8  }
  0x22   :  { %45 = dma.hbm_to_vmem [thread:$0]  %s1619_s2, 2048, %s40_s29, [#allocation7], %s1007_s1, %s1007_s1, %s1008_s6  }
  0x23   :  { %s1009_s9 = smov [#allocation9]  }
  0x24   :  { %s51_s10 = sshll.u32 %s1009_s9, 4  ;;  %s52_s10 = int_to_ptr.vmem [resolvable:$true] %s51_s10 }
  0x25   :  { %s976_s0 = scalar_lea.vmem %s52_s10, 2048  ;;  %p981_p2 = scmp.lt.s32.totalorder %s52_s10, %s52_s10 }
  0x26   :  { %p977_p1 = scmp.ne.s32.totalorder %s52_s10, %s976_s0  ;;  %p982_p3 = scmp.lt.s32.totalorder %s976_s0, %s976_s0 }
  0x28   :  { %p983_p4 = por %p982_p3, %p981_p2 }
  0x2a   :  { %p984_p5 = pnand %p983_p4, %p977_p1 }
  0x2c   :  { %987 = shalt.err (!%p984_p5)
}
  0x2d   :  { %57 = dma.hbm_to_vmem [thread:$0]  %s1620_s3, 2048, %s52_s10, [#allocation10], %s1007_s1, %s1007_s1, %s1008_s6  }
  0x2e   :  { %996 = dma.done.wait [#allocation4], 128  }
  0x2f   :  { %997 = vsyncadd [#allocation4], 4294967168 }
  0x30   :  { %998 = dma.done.wait [#allocation7], 2176  }
  0x31   :  { %999 = vsyncadd [#allocation7], 4294965120 }
  0x32   :  { %1000 = dma.done.wait [#allocation10], 2048  }
  0x33   :  { %1001 = vsyncadd [#allocation10], 4294965248  ;;  %v113_v0 = vlaneseq  ;;  %v112_v7 = vld [vmem:[%s1621_s4] sm:$0x1]  ;;  %v95_v10 = vld [vmem:[#allocation8 + $0x78] sm:$0xff]  ;;  %vm1010_vm11 = vmmov 1  }
  0x34   :  { %v127_v8 = vadd.f32 0.05, %v112_v7  ;;  %v772_v9 = vadd.f32 -0.05, %v112_v7  ;;  %v111_v17 = vld [vmem:[#allocation9 + $0x78] sm:$0xff]  ;;  %v1011_v21 = vmov 1.0  }
  0x35   :  { %v1057_v1 = vshrl.u32 %v113_v0, 7  ;;  %v1059_v2 = vand.u32 127, %v113_v0  ;;  %v94_v22 = vld [vmem:[#allocation8 + $0x70] sm:$0xff]  ;;  %v93_v31 = vld [vmem:[#allocation8 + $0x68] sm:$0xff]  ;;  %v92_v38 = vld [vmem:[#allocation8 + $0x60] sm:$0xff]  ;;  %s1014_s16 = smov [#allocation11]  }
  0x36   :  { %v110_v24 = vld [vmem:[#allocation9 + $0x70] sm:$0xff]  ;;  %v109_v34 = vld [vmem:[#allocation9 + $0x68] sm:$0xff]  ;;  %v108_v40 = vld [vmem:[#allocation9 + $0x60] sm:$0xff] }
  0x37   :  { %v145_v3 = vadd.s32 120, %v1057_v1  ;;  %v185_v4 = vsub.s32 0, %v1057_v1  ;;  %v144_v5 = vadd.s32 112, %v1057_v1  ;;  %v1065_v6 = vadd.s32 64, %v1057_v1  ;;  %v91_v44 = vld [vmem:[#allocation8 + $0x58] sm:$0xff]  ;;  %v90_v50 = vld [vmem:[#allocation8 + $0x50] sm:$0xff] }
  0x38   :  { %vm115_vm0 = vcmp.lt.s32.totalorder %v1059_v2, 16  ;;  %v1075_v11 = vadd.s32 56, %v1057_v1  ;;  %v1078_v12 = vadd.s32 48, %v1057_v1  ;;  %v1081_v13 = vadd.s32 40, %v1057_v1  ;;  %v107_v46 = vld [vmem:[#allocation9 + $0x58] sm:$0xff]  ;;  %v106_v51 = vld [vmem:[#allocation9 + $0x50] sm:$0xff] }
  0x39   :  { %vm164_vm1 = vcmp.ne.s32.totalorder %v145_v3, %v1059_v2  ;;  %vm157_vm2 = vcmp.ne.s32.totalorder %v1065_v6, %v1059_v2  ;;  %v1084_v14 = vadd.s32 32, %v1057_v1  ;;  %v1086_v15 = vrot.slane %v127_v8, %v185_v4  ;;  %v89_v55 = vld [vmem:[#allocation8 + $0x48] sm:$0xff]  ;;  %v88_v60 = vld [vmem:[#allocation8 + $0x40] sm:$0xff]  ;;  %v87_v3 = vld [vmem:[#allocation8 + $0x38] sm:$0xff] }
  0x3a   :  { %v1088_v16 = vrot.slane %v772_v9, %v185_v4  ;;  %vm163_vm3 = vcmp.ne.s32.totalorder %v144_v5, %v1059_v2  ;;  %vm1103_vm8 = vmand %vm164_vm1, %vm115_vm0  ;;  %v143_v23 = vadd.s32 104, %v1057_v1  ;;  %v1132_v25 = vadd.s32 24, %v1057_v1  ;;  %v105_v57 = vld [vmem:[#allocation9 + $0x48] sm:$0xff]  ;;  %v104_v62 = vld [vmem:[#allocation9 + $0x40] sm:$0xff] }
  0x3b   :  { %vm203_vm9 = vcmp.gt.f32.partialorder %v95_v10, %v1086_v15  ;;  %vm321_vm14 = vcmp.gt.f32.partialorder %v111_v17, %v1086_v15  ;;  %vm1113_vm15 = vmand %vm163_vm3, %vm115_vm0  ;;  %v1164_v30 = vadd.s32 16, %v1057_v1  ;;  %v142_v32 = vadd.s32 96, %v1057_v1  ;;  %v103_v5 = vld [vmem:[#allocation9 + $0x38] sm:$0xff]  ;;  %v86_v8 = vld [vmem:[#allocation8 + $0x30] sm:$0xff] }
  0x3c   :  { %vm225_vm10 = vcmp.lt.f32.partialorder %v95_v10, %v1088_v16  ;;  %vm241_vm12 = vmxor %vm203_vm9, %vm1010_vm11  ;;  %vm337_vm7 = vcmp.lt.f32.partialorder %v111_v17, %v1088_v16  ;;  %v1176_v33 = vadd.s32 8, %v1057_v1  ;;  %v141_v39 = vadd.s32 88, %v1057_v1  ;;  %v101_v19 = vld [vmem:[#allocation9 + $0x28] sm:$0xff]  ;;  %v99_v29 = vld [vmem:[#allocation9 + $0x18] sm:$0xff] }
  0x3d   :  { %vm257_vm13 = vmand %vm225_vm10, %vm241_vm12  ;;  %vm161_vm4 = vcmp.ne.s32.totalorder %v142_v32, %v1059_v2  ;;  %v140_v45 = vadd.s32 80, %v1057_v1  ;;  %v139_v54 = vadd.s32 72, %v1057_v1  ;;  %v96_v43 = vld [vmem:[#allocation9] sm:$0xff] }
  0x3e   :  { %vm273_vm1 = vmand %vm257_vm13, %vm1103_vm8 }
  0x3f   :  { %vm1120_vm6 = vmor %vm203_vm9, %vm273_vm1  ;;  %810 = vmatprep.subr.msk.mxu0 %vm273_vm1, %v1011_v21  ;;  %vm202_vm9 = vcmp.gt.f32.partialorder %v94_v22, %v1086_v15  ;;  %vm224_vm1 = vcmp.lt.f32.partialorder %v94_v22, %v1088_v16 }
  0x40   :  { %vm353_vm10 = vmxor %vm321_vm14, %vm1010_vm11 }
  0x41   :  { %vm369_vm3 = vmand %vm337_vm7, %vm353_vm10  ;;  %vm162_vm7 = vcmp.ne.s32.totalorder %v143_v23, %v1059_v2 }
  0x42   :  { %vm385_vm12 = vmand %vm369_vm3, %vm1103_vm8  ;;  %vm320_vm3 = vcmp.gt.f32.partialorder %v110_v24, %v1086_v15 }
  0x43   :  { %vm401_vm5 = vmor %vm321_vm14, %vm385_vm12  ;;  %845 = vmatprep.subr.msk.mxu1 %vm385_vm12, %v1011_v21 }
  0x44   :  { %vm305_vm13 = vmand %vm1120_vm6, %vm1103_vm8  ;;  %vm336_vm6 = vcmp.lt.f32.partialorder %v110_v24, %v1088_v16 }
  0x45   :  { %v433_v26 = vsel %vm305_vm13, %v95_v10, 0.0  ;;  %vm417_vm14 = vmand %vm401_vm5, %vm1103_vm8  ;;  %vm223_vm5 = vcmp.lt.f32.partialorder %v93_v31, %v1088_v16  ;;  %v102_v10 = vld [vmem:[#allocation9 + $0x30] sm:$0xff] }
  0x46   :  { %811 = vmatpush3.msra.mxu0 %v433_v26  ;;  %v465_v27 = vsel %vm417_vm14, %v111_v17, 0.0  ;;  %vm240_vm10 = vmxor %vm202_vm9, %vm1010_vm11  ;;  %vm335_vm14 = vcmp.lt.f32.partialorder %v109_v34, %v1088_v16 }
  0x47   :  { %846 = vmatpush3.msra.mxu1 %v465_v27  ;;  %vm1146_vm12 = vmand %vm224_vm1, %vm240_vm10 }
  0x48   :  { %vm1153_vm13 = vmand %vm162_vm7, %vm115_vm0 }
  0x49   :  { %vm272_vm8 = vmand %vm1146_vm12, %vm1113_vm15 }
  0x4a   :  { %812 = vmatprep.subr.msk.mxu0 %vm272_vm8, %v1011_v21  ;;  %vm352_vm1 = vmxor %vm320_vm3, %vm1010_vm11 }
  0x4b   :  { %vm368_vm7 = vmand %vm336_vm6, %vm352_vm1  ;;  %vm201_vm1 = vcmp.gt.f32.partialorder %v93_v31, %v1086_v15 }
  0x4c   :  { %vm384_vm10 = vmand %vm368_vm7, %vm1113_vm15 }
  0x4d   :  { %847 = vmatprep.subr.msk.mxu1 %vm384_vm10, %v1011_v21  ;;  %vm288_vm12 = vmor %vm202_vm9, %vm272_vm8 }
  0x4e   :  { %vm304_vm6 = vmand %vm288_vm12, %vm1113_vm15  ;;  %vm319_vm12 = vcmp.gt.f32.partialorder %v109_v34, %v1086_v15 }
  0x4f   :  { %v432_v35 = vsel %vm304_vm6, %v94_v22, 0.0  ;;  %vm400_vm7 = vmor %vm320_vm3, %vm384_vm10 }
  0x50   :  { %813 = vmatpush3.msra.mxu0 %v432_v35  ;;  %vm416_vm9 = vmand %vm400_vm7, %vm1113_vm15  ;;  %v98_v35 = vld [vmem:[#allocation9 + $0x10] sm:$0xff] }
  0x51   :  { %v464_v36 = vsel %vm416_vm9, %v110_v24, 0.0  ;;  %vm239_vm8 = vmxor %vm201_vm1, %vm1010_vm11  ;;  %v100_v24 = vld [vmem:[#allocation9 + $0x20] sm:$0xff] }
  0x52   :  { %848 = vmatpush3.msra.mxu1 %v464_v36  ;;  %vm255_vm6 = vmand %vm223_vm5, %vm239_vm8  ;;  %vm200_vm8 = vcmp.gt.f32.partialorder %v92_v38, %v1086_v15 }
  0x53   :  { %vm1199_vm3 = vmand %vm161_vm4, %vm115_vm0 }
  0x54   :  { %vm271_vm15 = vmand %vm255_vm6, %vm1153_vm13  ;;  %vm222_vm6 = vcmp.lt.f32.partialorder %v92_v38, %v1088_v16 }
  0x55   :  { %814 = vmatprep.subr.msk.mxu0 %vm271_vm15, %v1011_v21  ;;  %vm351_vm10 = vmxor %vm319_vm12, %vm1010_vm11 }
  0x56   :  { %vm367_vm7 = vmand %vm335_vm14, %vm351_vm10  ;;  %vm160_vm10 = vcmp.ne.s32.totalorder %v141_v39, %v1059_v2  ;;  %v97_v39 = vld [vmem:[#allocation9 + $0x8] sm:$0xff] }
  0x57   :  { %vm383_vm5 = vmand %vm367_vm7, %vm1153_vm13  ;;  %vm159_vm7 = vcmp.ne.s32.totalorder %v140_v45, %v1059_v2 }
  0x58   :  { %849 = vmatprep.subr.msk.mxu1 %vm383_vm5, %v1011_v21  ;;  %vm287_vm4 = vmor %vm201_vm1, %vm271_vm15 }
  0x59   :  { %vm303_vm9 = vmand %vm287_vm4, %vm1153_vm13  ;;  %vm318_vm4 = vcmp.gt.f32.partialorder %v108_v40, %v1086_v15 }
  0x5a   :  { %v431_v41 = vsel %vm303_vm9, %v93_v31, 0.0  ;;  %vm399_vm14 = vmor %vm319_vm12, %vm383_vm5  ;;  %vm334_vm5 = vcmp.lt.f32.partialorder %v108_v40, %v1088_v16 }
  0x5b   :  { %815 = vmatpush3.msra.mxu0 %v431_v41  ;;  %vm415_vm1 = vmand %vm399_vm14, %vm1153_vm13 }
  0x5c   :  { %v463_v42 = vsel %vm415_vm1, %v109_v34, 0.0  ;;  %vm238_vm15 = vmxor %vm200_vm8, %vm1010_vm11 }
  0x5d   :  { %850 = vmatpush3.msra.mxu1 %v463_v42  ;;  %vm254_vm12 = vmand %vm222_vm6, %vm238_vm15 }
  0x5e   :  { %vm1233_vm9 = vmand %vm160_vm10, %vm115_vm0 }
  0x5f   :  { %vm270_vm13 = vmand %vm254_vm12, %vm1199_vm3  ;;  %vm199_vm12 = vcmp.gt.f32.partialorder %v91_v44, %v1086_v15 }
  0x60   :  { %816 = vmatprep.subr.msk.mxu0 %vm270_vm13, %v1011_v21  ;;  %vm350_vm14 = vmxor %vm318_vm4, %vm1010_vm11 }
  0x61   :  { %vm366_vm1 = vmand %vm334_vm5, %vm350_vm14  ;;  %vm221_vm14 = vcmp.lt.f32.partialorder %v91_v44, %v1088_v16 }
  0x62   :  { %vm382_vm6 = vmand %vm366_vm1, %vm1199_vm3 }
  0x63   :  { %851 = vmatprep.subr.msk.mxu1 %vm382_vm6, %v1011_v21  ;;  %vm286_vm10 = vmor %vm200_vm8, %vm270_vm13  ;;  %vm317_vm13 = vcmp.gt.f32.partialorder %v107_v46, %v1086_v15 }
  0x64   :  { %vm302_vm15 = vmand %vm286_vm10, %vm1199_vm3 }
  0x65   :  { %v430_v47 = vsel %vm302_vm15, %v92_v38, 0.0  ;;  %vm398_vm5 = vmor %vm318_vm4, %vm382_vm6  ;;  %vm333_vm15 = vcmp.lt.f32.partialorder %v107_v46, %v1088_v16 }
  0x66   :  { %817 = vmatpush3.msra.mxu0 %v430_v47  ;;  %vm414_vm1 = vmand %vm398_vm5, %vm1199_vm3  ;;  %v1012_v47 = vmov 0.0  }
  0x67   :  { %v462_v48 = vsel %vm414_vm1, %v108_v40, 0.0  ;;  %vm237_vm8 = vmxor %vm199_vm12, %vm1010_vm11 }
  0x68   :  { %852 = vmatpush3.msra.mxu1 %v462_v48  ;;  %vm253_vm10 = vmand %vm221_vm14, %vm237_vm8  ;;  %vm198_vm8 = vcmp.gt.f32.partialorder %v90_v50, %v1086_v15 }
  0x69   :  { %vm1265_vm4 = vmand %vm159_vm7, %vm115_vm0 }
  0x6a   :  { %vm269_vm3 = vmand %vm253_vm10, %vm1233_vm9 }
  0x6b   :  { %818 = vmatprep.subr.msk.mxu0 %vm269_vm3, %v1011_v21  ;;  %vm349_vm6 = vmxor %vm317_vm13, %vm1010_vm11 }
  0x6c   :  { %vm365_vm5 = vmand %vm333_vm15, %vm349_vm6  ;;  %vm220_vm15 = vcmp.lt.f32.partialorder %v90_v50, %v1088_v16 }
  0x6d   :  { %vm381_vm14 = vmand %vm365_vm5, %vm1233_vm9 }
  0x6e   :  { %853 = vmatprep.subr.msk.mxu1 %vm381_vm14, %v1011_v21  ;;  %vm285_vm7 = vmor %vm199_vm12, %vm269_vm3  ;;  %vm316_vm3 = vcmp.gt.f32.partialorder %v106_v51, %v1086_v15 }
  0x6f   :  { %vm301_vm1 = vmand %vm285_vm7, %vm1233_vm9  ;;  %vm332_vm7 = vcmp.lt.f32.partialorder %v106_v51, %v1088_v16 }
  0x70   :  { %v429_v52 = vsel %vm301_vm1, %v91_v44, 0.0  ;;  %vm397_vm10 = vmor %vm317_vm13, %vm381_vm14 }
  0x71   :  { %819 = vmatpush3.msra.mxu0 %v429_v52  ;;  %vm413_vm6 = vmand %vm397_vm10, %vm1233_vm9 }
  0x72   :  { %v461_v53 = vsel %vm413_vm6, %v107_v46, 0.0  ;;  %vm236_vm12 = vmxor %vm198_vm8, %vm1010_vm11  ;;  %vm158_vm6 = vcmp.ne.s32.totalorder %v139_v54, %v1059_v2 }
  0x73   :  { %854 = vmatpush3.msra.mxu1 %v461_v53  ;;  %vm252_vm5 = vmand %vm220_vm15, %vm236_vm12 }
  0x74   :  { %vm268_vm13 = vmand %vm252_vm5, %vm1265_vm4  ;;  %vm197_vm5 = vcmp.gt.f32.partialorder %v89_v55, %v1086_v15 }
  0x75   :  { %820 = vmatprep.subr.msk.mxu0 %vm268_vm13, %v1011_v21  ;;  %vm348_vm9 = vmxor %vm316_vm3, %vm1010_vm11 }
  0x76   :  { %vm364_vm14 = vmand %vm332_vm7, %vm348_vm9  ;;  %vm219_vm9 = vcmp.lt.f32.partialorder %v89_v55, %v1088_v16 }
  0x77   :  { %vm380_vm1 = vmand %vm364_vm14, %vm1265_vm4 }
  0x78   :  { %855 = vmatprep.subr.msk.mxu1 %vm380_vm1, %v1011_v21  ;;  %vm284_vm10 = vmor %vm198_vm8, %vm268_vm13  ;;  %vm315_vm13 = vcmp.gt.f32.partialorder %v105_v57, %v1086_v15 }
  0x79   :  { %vm300_vm15 = vmand %vm284_vm10, %vm1265_vm4 }
  0x7a   :  { %v428_v56 = vsel %vm300_vm15, %v90_v50, 0.0  ;;  %vm396_vm12 = vmor %vm316_vm3, %vm380_vm1  ;;  %vm331_vm1 = vcmp.lt.f32.partialorder %v105_v57, %v1088_v16 }
  0x7b   :  { %821 = vmatpush3.msra.mxu0 %v428_v56  ;;  %vm412_vm7 = vmand %vm396_vm12, %vm1265_vm4 }
  0x7c   :  { %v460_v58 = vsel %vm412_vm7, %v106_v51, 0.0  ;;  %vm1316_vm8 = vmand %vm158_vm6, %vm115_vm0 }
  0x7d   :  { %856 = vmatpush3.msra.mxu1 %v460_v58  ;;  %vm235_vm3 = vmxor %vm197_vm5, %vm1010_vm11 }
  0x7e   :  { %vm251_vm14 = vmand %vm219_vm9, %vm235_vm3  ;;  %vm196_vm3 = vcmp.gt.f32.partialorder %v88_v60, %v1086_v15 }
  0x7f   :  { %vm267_vm4 = vmand %vm251_vm14, %vm1316_vm8 }
  0x80   :  { %822 = vmatprep.subr.msk.mxu0 %vm267_vm4, %v1011_v21  ;;  %vm347_vm10 = vmxor %vm315_vm13, %vm1010_vm11 }
  0x81   :  { %vm363_vm15 = vmand %vm331_vm1, %vm347_vm10  ;;  %vm218_vm1 = vcmp.lt.f32.partialorder %v88_v60, %v1088_v16  ;;  %vm330_vm10 = vcmp.lt.f32.partialorder %v104_v62, %v1088_v16 }
  0x82   :  { %vm379_vm6 = vmand %vm363_vm15, %vm1316_vm8 }
  0x83   :  { %857 = vmatprep.subr.msk.mxu1 %vm379_vm6, %v1011_v21  ;;  %vm283_vm12 = vmor %vm197_vm5, %vm267_vm4  ;;  %vm314_vm4 = vcmp.gt.f32.partialorder %v104_v62, %v1086_v15 }
  0x84   :  { %vm299_vm7 = vmand %vm283_vm12, %vm1316_vm8 }
  0x85   :  { %v427_v61 = vsel %vm299_vm7, %v89_v55, 0.0  ;;  %vm395_vm9 = vmor %vm315_vm13, %vm379_vm6 }
  0x86   :  { %823 = vmatpush3.msra.mxu0 %v427_v61  ;;  %vm411_vm14 = vmand %vm395_vm9, %vm1316_vm8 }
  0x87   :  { %v459_v63 = vsel %vm411_vm14, %v105_v57, 0.0  ;;  %vm1345_vm5 = vmand %vm157_vm2, %vm115_vm0 }
  0x88   :  { %858 = vmatpush3.msra.mxu1 %v459_v63  ;;  %vm234_vm13 = vmxor %vm196_vm3, %vm1010_vm11 }
  0x89   :  { %vm250_vm8 = vmand %vm218_vm1, %vm234_vm13  ;;  %vm195_vm1 = vcmp.gt.f32.partialorder %v87_v3, %v1086_v15 }
  0x8a   :  { %vm266_vm15 = vmand %vm250_vm8, %vm1345_vm5  ;;  %vm217_vm8 = vcmp.lt.f32.partialorder %v87_v3, %v1088_v16 }
  0x8b   :  { %824 = vmatprep.subr.msk.mxu0 %vm266_vm15, %v1011_v21  ;;  %vm346_vm2 = vmxor %vm314_vm4, %vm1010_vm11 }
  0x8c   :  { %vm362_vm6 = vmand %vm330_vm10, %vm346_vm2  ;;  %vm329_vm2 = vcmp.lt.f32.partialorder %v103_v5, %v1088_v16 }
  0x8d   :  { %vm378_vm12 = vmand %vm362_vm6, %vm1345_vm5 }
  0x8e   :  { %859 = vmatprep.subr.msk.mxu1 %vm378_vm12, %v1011_v21  ;;  %vm282_vm7 = vmor %vm196_vm3, %vm266_vm15  ;;  %vm1643_vm3 = vcmp.ne.s32.totalorder %v1075_v11, %v1059_v2  ;;  %vm313_vm15 = vcmp.gt.f32.partialorder %v103_v5, %v1086_v15 }
  0x8f   :  { %vm298_vm9 = vmand %vm282_vm7, %vm1345_vm5 }
  0x90   :  { %v426_v4 = vsel %vm298_vm9, %v88_v60, 0.0  ;;  %vm394_vm14 = vmor %vm314_vm4, %vm378_vm12 }
  0x91   :  { %825 = vmatpush3.msra.mxu0 %v426_v4  ;;  %vm410_vm13 = vmand %vm394_vm14, %vm1345_vm5 }
  0x92   :  { %v458_v6 = vsel %vm410_vm13, %v104_v62, 0.0  ;;  %vm1374_vm10 = vmand %vm1643_vm3, %vm115_vm0  ;;  %vm194_vm3 = vcmp.gt.f32.partialorder %v86_v8, %v1086_v15 }
  0x93   :  { %860 = vmatpush3.msra.mxu1 %v458_v6  ;;  %vm233_vm4 = vmxor %vm195_vm1, %vm1010_vm11 }
  0x94   :  { %vm249_vm5 = vmand %vm217_vm8, %vm233_vm4 }
  0x95   :  { %vm265_vm6 = vmand %vm249_vm5, %vm1374_vm10  ;;  %vm216_vm5 = vcmp.lt.f32.partialorder %v86_v8, %v1088_v16 }
  0x96   :  { %826 = vmatprep.subr.msk.mxu0 %vm265_vm6, %v1011_v21  ;;  %vm345_vm12 = vmxor %vm313_vm15, %vm1010_vm11 }
  0x97   :  { %vm361_vm7 = vmand %vm329_vm2, %vm345_vm12  ;;  %vm328_vm12 = vcmp.lt.f32.partialorder %v102_v10, %v1088_v16 }
  0x98   :  { %vm377_vm9 = vmand %vm361_vm7, %vm1374_vm10 }
  0x99   :  { %861 = vmatprep.subr.msk.mxu1 %vm377_vm9, %v1011_v21  ;;  %vm281_vm14 = vmor %vm195_vm1, %vm265_vm6  ;;  %vm1646_vm1 = vcmp.ne.s32.totalorder %v1078_v12, %v1059_v2  ;;  %vm312_vm6 = vcmp.gt.f32.partialorder %v102_v10, %v1086_v15  ;;  %v85_v12 = vld [vmem:[#allocation8 + $0x28] sm:$0xff] }
  0x9a   :  { %vm297_vm13 = vmand %vm281_vm14, %vm1374_vm10 }
  0x9b   :  { %v425_v9 = vsel %vm297_vm13, %v87_v3, 0.0  ;;  %vm393_vm8 = vmor %vm313_vm15, %vm377_vm9 }
  0x9c   :  { %827 = vmatpush3.msra.mxu0 %v425_v9  ;;  %vm409_vm4 = vmand %vm393_vm8, %vm1374_vm10 }
  0x9d   :  { %v457_v11 = vsel %vm409_vm4, %v103_v5, 0.0  ;;  %vm1403_vm2 = vmand %vm1646_vm1, %vm115_vm0  ;;  %vm193_vm1 = vcmp.gt.f32.partialorder %v85_v12, %v1086_v15 }
  0x9e   :  { %862 = vmatpush3.msra.mxu1 %v457_v11  ;;  %vm232_vm15 = vmxor %vm194_vm3, %vm1010_vm11 }
  0x9f   :  { %vm248_vm10 = vmand %vm216_vm5, %vm232_vm15 }
  0xa0   :  { %vm264_vm7 = vmand %vm248_vm10, %vm1403_vm2  ;;  %vm215_vm10 = vcmp.lt.f32.partialorder %v85_v12, %v1088_v16 }
  0xa1   :  { %828 = vmatprep.subr.msk.mxu0 %vm264_vm7, %v1011_v21  ;;  %vm344_vm9 = vmxor %vm312_vm6, %vm1010_vm11 }
  0xa2   :  { %vm360_vm14 = vmand %vm328_vm12, %vm344_vm9  ;;  %vm327_vm9 = vcmp.lt.f32.partialorder %v101_v19, %v1088_v16 }
  0xa3   :  { %vm376_vm13 = vmand %vm360_vm14, %vm1403_vm2 }
  0xa4   :  { %863 = vmatprep.subr.msk.mxu1 %vm376_vm13, %v1011_v21  ;;  %vm280_vm8 = vmor %vm194_vm3, %vm264_vm7  ;;  %vm1649_vm3 = vcmp.ne.s32.totalorder %v1081_v13, %v1059_v2  ;;  %vm311_vm7 = vcmp.gt.f32.partialorder %v101_v19, %v1086_v15  ;;  %v84_v13 = vld [vmem:[#allocation8 + $0x20] sm:$0xff] }
  0xa5   :  { %vm296_vm4 = vmand %vm280_vm8, %vm1403_vm2 }
  0xa6   :  { %v424_v18 = vsel %vm296_vm4, %v86_v8, 0.0  ;;  %vm392_vm5 = vmor %vm312_vm6, %vm376_vm13 }
  0xa7   :  { %829 = vmatpush3.msra.mxu0 %v424_v18  ;;  %vm408_vm15 = vmand %vm392_vm5, %vm1403_vm2 }
  0xa8   :  { %v456_v20 = vsel %vm408_vm15, %v102_v10, 0.0  ;;  %vm1432_vm12 = vmand %vm1649_vm3, %vm115_vm0  ;;  %vm192_vm3 = vcmp.gt.f32.partialorder %v84_v13, %v1086_v15 }
  0xa9   :  { %864 = vmatpush3.msra.mxu1 %v456_v20  ;;  %vm231_vm6 = vmxor %vm193_vm1, %vm1010_vm11 }
  0xaa   :  { %vm247_vm2 = vmand %vm215_vm10, %vm231_vm6 }
  0xab   :  { %vm263_vm14 = vmand %vm247_vm2, %vm1432_vm12  ;;  %vm214_vm2 = vcmp.lt.f32.partialorder %v84_v13, %v1088_v16 }
  0xac   :  { %830 = vmatprep.subr.msk.mxu0 %vm263_vm14, %v1011_v21  ;;  %vm343_vm13 = vmxor %vm311_vm7, %vm1010_vm11 }
  0xad   :  { %vm359_vm8 = vmand %vm327_vm9, %vm343_vm13  ;;  %vm326_vm13 = vcmp.lt.f32.partialorder %v100_v24, %v1088_v16 }
  0xae   :  { %vm375_vm4 = vmand %vm359_vm8, %vm1432_vm12 }
  0xaf   :  { %865 = vmatprep.subr.msk.mxu1 %vm375_vm4, %v1011_v21  ;;  %vm279_vm5 = vmor %vm193_vm1, %vm263_vm14  ;;  %vm1652_vm1 = vcmp.ne.s32.totalorder %v1084_v14, %v1059_v2  ;;  %vm310_vm14 = vcmp.gt.f32.partialorder %v100_v24, %v1086_v15  ;;  %v83_v14 = vld [vmem:[#allocation8 + $0x18] sm:$0xff] }
  0xb0   :  { %vm295_vm15 = vmand %vm279_vm5, %vm1432_vm12 }
  0xb1   :  { %v423_v23 = vsel %vm295_vm15, %v85_v12, 0.0  ;;  %vm391_vm10 = vmor %vm311_vm7, %vm375_vm4 }
  0xb2   :  { %831 = vmatpush3.msra.mxu0 %v423_v23  ;;  %vm407_vm6 = vmand %vm391_vm10, %vm1432_vm12 }
  0xb3   :  { %v455_v26 = vsel %vm407_vm6, %v101_v19, 0.0  ;;  %vm1461_vm9 = vmand %vm1652_vm1, %vm115_vm0  ;;  %vm191_vm1 = vcmp.gt.f32.partialorder %v83_v14, %v1086_v15 }
  0xb4   :  { %866 = vmatpush3.msra.mxu1 %v455_v26  ;;  %vm230_vm7 = vmxor %vm192_vm3, %vm1010_vm11 }
  0xb5   :  { %vm246_vm12 = vmand %vm214_vm2, %vm230_vm7 }
  0xb6   :  { %vm262_vm8 = vmand %vm246_vm12, %vm1461_vm9  ;;  %vm213_vm12 = vcmp.lt.f32.partialorder %v83_v14, %v1088_v16 }
  0xb7   :  { %832 = vmatprep.subr.msk.mxu0 %vm262_vm8, %v1011_v21  ;;  %vm342_vm4 = vmxor %vm310_vm14, %vm1010_vm11 }
  0xb8   :  { %vm358_vm5 = vmand %vm326_vm13, %vm342_vm4  ;;  %vm325_vm4 = vcmp.lt.f32.partialorder %v99_v29, %v1088_v16 }
  0xb9   :  { %vm374_vm15 = vmand %vm358_vm5, %vm1461_vm9 }
  0xba   :  { %867 = vmatprep.subr.msk.mxu1 %vm374_vm15, %v1011_v21  ;;  %vm278_vm10 = vmor %vm192_vm3, %vm262_vm8  ;;  %vm1655_vm3 = vcmp.ne.s32.totalorder %v1132_v25, %v1059_v2  ;;  %vm309_vm8 = vcmp.gt.f32.partialorder %v99_v29, %v1086_v15  ;;  %v82_v25 = vld [vmem:[#allocation8 + $0x10] sm:$0xff] }
  0xbb   :  { %vm294_vm6 = vmand %vm278_vm10, %vm1461_vm9 }
  0xbc   :  { %v422_v28 = vsel %vm294_vm6, %v84_v13, 0.0  ;;  %vm390_vm2 = vmor %vm310_vm14, %vm374_vm15 }
  0xbd   :  { %833 = vmatpush3.msra.mxu0 %v422_v28  ;;  %vm406_vm7 = vmand %vm390_vm2, %vm1461_vm9 }
  0xbe   :  { %v454_v31 = vsel %vm406_vm7, %v100_v24, 0.0  ;;  %vm1490_vm13 = vmand %vm1655_vm3, %vm115_vm0  ;;  %vm190_vm3 = vcmp.gt.f32.partialorder %v82_v25, %v1086_v15 }
  0xbf   :  { %868 = vmatpush3.msra.mxu1 %v454_v31  ;;  %vm229_vm14 = vmxor %vm191_vm1, %vm1010_vm11 }
  0xc0   :  { %vm245_vm9 = vmand %vm213_vm12, %vm229_vm14 }
  0xc1   :  { %vm261_vm5 = vmand %vm245_vm9, %vm1490_vm13  ;;  %vm212_vm9 = vcmp.lt.f32.partialorder %v82_v25, %v1088_v16 }
  0xc2   :  { %834 = vmatprep.subr.msk.mxu0 %vm261_vm5, %v1011_v21  ;;  %vm341_vm15 = vmxor %vm309_vm8, %vm1010_vm11 }
  0xc3   :  { %vm357_vm10 = vmand %vm325_vm4, %vm341_vm15  ;;  %vm324_vm15 = vcmp.lt.f32.partialorder %v98_v35, %v1088_v16 }
  0xc4   :  { %vm373_vm6 = vmand %vm357_vm10, %vm1490_vm13 }
  0xc5   :  { %869 = vmatprep.subr.msk.mxu1 %vm373_vm6, %v1011_v21  ;;  %vm277_vm2 = vmor %vm191_vm1, %vm261_vm5  ;;  %vm1658_vm1 = vcmp.ne.s32.totalorder %v1164_v30, %v1059_v2  ;;  %vm308_vm5 = vcmp.gt.f32.partialorder %v98_v35, %v1086_v15  ;;  %v81_v30 = vld [vmem:[#allocation8 + $0x8] sm:$0xff] }
  0xc6   :  { %vm293_vm7 = vmand %vm277_vm2, %vm1490_vm13 }
  0xc7   :  { %v421_v34 = vsel %vm293_vm7, %v83_v14, 0.0  ;;  %vm389_vm12 = vmor %vm309_vm8, %vm373_vm6 }
  0xc8   :  { %835 = vmatpush3.msra.mxu0 %v421_v34  ;;  %vm405_vm14 = vmand %vm389_vm12, %vm1490_vm13 }
  0xc9   :  { %v453_v36 = vsel %vm405_vm14, %v99_v29, 0.0  ;;  %vm1519_vm4 = vmand %vm1658_vm1, %vm115_vm0  ;;  %vm189_vm1 = vcmp.gt.f32.partialorder %v81_v30, %v1086_v15 }
  0xca   :  { %870 = vmatpush3.msra.mxu1 %v453_v36  ;;  %vm228_vm8 = vmxor %vm190_vm3, %vm1010_vm11 }
  0xcb   :  { %vm244_vm13 = vmand %vm212_vm9, %vm228_vm8 }
  0xcc   :  { %vm260_vm10 = vmand %vm244_vm13, %vm1519_vm4  ;;  %vm211_vm13 = vcmp.lt.f32.partialorder %v81_v30, %v1088_v16 }
  0xcd   :  { %836 = vmatprep.subr.msk.mxu0 %vm260_vm10, %v1011_v21  ;;  %vm340_vm6 = vmxor %vm308_vm5, %vm1010_vm11 }
  0xce   :  { %vm356_vm2 = vmand %vm324_vm15, %vm340_vm6  ;;  %vm323_vm6 = vcmp.lt.f32.partialorder %v97_v39, %v1088_v16 }
  0xcf   :  { %vm372_vm7 = vmand %vm356_vm2, %vm1519_vm4 }
  0xd0   :  { %871 = vmatprep.subr.msk.mxu1 %vm372_vm7, %v1011_v21  ;;  %vm276_vm12 = vmor %vm190_vm3, %vm260_vm10  ;;  %vm1661_vm3 = vcmp.ne.s32.totalorder %v1176_v33, %v1059_v2  ;;  %vm307_vm10 = vcmp.gt.f32.partialorder %v97_v39, %v1086_v15  ;;  %v80_v33 = vld [vmem:[#allocation8] sm:$0xff] }
  0xd1   :  { %vm292_vm14 = vmand %vm276_vm12, %vm1519_vm4 }
  0xd2   :  { %v420_v38 = vsel %vm292_vm14, %v82_v25, 0.0  ;;  %vm388_vm9 = vmor %vm308_vm5, %vm372_vm7 }
  0xd3   :  { %837 = vmatpush3.msra.mxu0 %v420_v38  ;;  %vm404_vm8 = vmand %vm388_vm9, %vm1519_vm4 }
  0xd4   :  { %v452_v40 = vsel %vm404_vm8, %v98_v35, 0.0  ;;  %vm1548_vm15 = vmand %vm1661_vm3, %vm115_vm0  ;;  %vm188_vm3 = vcmp.gt.f32.partialorder %v80_v33, %v1086_v15 }
  0xd5   :  { %872 = vmatpush3.msra.mxu1 %v452_v40  ;;  %vm227_vm5 = vmxor %vm189_vm1, %vm1010_vm11 }
  0xd6   :  { %vm243_vm4 = vmand %vm211_vm13, %vm227_vm5 }
  0xd7   :  { %vm259_vm2 = vmand %vm243_vm4, %vm1548_vm15  ;;  %vm210_vm4 = vcmp.lt.f32.partialorder %v80_v33, %v1088_v16 }
  0xd8   :  { %838 = vmatprep.subr.msk.mxu0 %vm259_vm2, %v1011_v21  ;;  %vm339_vm7 = vmxor %vm307_vm10, %vm1010_vm11 }
  0xd9   :  { %vm355_vm12 = vmand %vm323_vm6, %vm339_vm7  ;;  %vm322_vm7 = vcmp.lt.f32.partialorder %v96_v43, %v1088_v16 }
  0xda   :  { %vm371_vm14 = vmand %vm355_vm12, %vm1548_vm15 }
  0xdb   :  { %873 = vmatprep.subr.msk.mxu1 %vm371_vm14, %v1011_v21  ;;  %vm275_vm9 = vmor %vm189_vm1, %vm259_vm2  ;;  %vm1664_vm1 = vcmp.ne.s32.totalorder %v1057_v1, %v1059_v2  ;;  %vm306_vm2 = vcmp.gt.f32.partialorder %v96_v43, %v1086_v15  ;;  %v78_v1 = vld [vmem:[#allocation3] sm:$0xff]  ;;  %v79_v15 = vld [vmem:[#allocation6] sm:$0xff] }
  0xdc   :  { %vm291_vm8 = vmand %vm275_vm9, %vm1548_vm15  ;;  %v123_v46 = vsub.f32 1.0, %v78_v1 }
  0xdd   :  { %v419_v42 = vsel %vm291_vm8, %v81_v30, 0.0  ;;  %vm387_vm13 = vmor %vm307_vm10, %vm371_vm14 }
  0xde   :  { %839 = vmatpush3.msra.mxu0 %v419_v42  ;;  %vm403_vm5 = vmand %vm387_vm13, %vm1548_vm15 }
  0xdf   :  { %v451_v44 = vsel %vm403_vm5, %v97_v39, 0.0  ;;  %vm1577_vm6 = vmand %vm1664_vm1, %vm115_vm0 }
  0xe0   :  { %874 = vmatpush3.msra.mxu1 %v451_v44  ;;  %vm226_vm10 = vmxor %vm188_vm3, %vm1010_vm11 }
  0xe1   :  { %vm242_vm15 = vmand %vm210_vm4, %vm226_vm10  ;;  %vm116_vm4 = vcmp.gt.f32.partialorder %v78_v1, 0.6 }
  0xe2   :  { %vm258_vm12 = vmand %vm242_vm15, %vm1577_vm6  ;;  %vm119_vm15 = vcmp.lt.f32.partialorder %v78_v1, 0.4 }
  0xe3   :  { %840 = vmatprep.subr.msk.mxu0 %vm258_vm12, %v1011_v21  ;;  %vm338_vm14 = vmxor %vm306_vm2, %vm1010_vm11 }
  0xe4   :  { %vm354_vm9 = vmand %vm322_vm7, %vm338_vm14 }
  0xe5   :  { %vm370_vm8 = vmand %vm354_vm9, %vm1577_vm6  ;;  %vm1013_vm9 = vmmov 0  }
  0xe6   :  { %875 = vmatprep.subr.msk.mxu1 %vm370_vm8, %v1011_v21  ;;  %vm274_vm13 = vmor %vm188_vm3, %vm258_vm12 }
  0xe7   :  { %vm290_vm5 = vmand %vm274_vm13, %vm1577_vm6 }
  0xe8   :  { %v418_v16 = vsel %vm290_vm5, %v80_v33, 0.0  ;;  %vm117_vm1 = vmand %vm115_vm0, %vm116_vm4 }
  0xe9   :  { %841 = vmatpush3.msra.mxu0 %v418_v16  ;;  %789 = vmatprep.mubr.msk.f32.mxu0 %vm117_vm1, %v123_v46  ;;  %vm386_vm10 = vmor %vm306_vm2, %vm370_vm8  ;;  %vm628_vm2 = vcmask 64512  }
  0xea   :  { %vm402_vm7 = vmand %vm386_vm10, %vm1577_vm6  ;;  %790 = vmatmul.mubr.msk.f32.vlgmr.msra.gmra.mxu0 %vm117_vm1, %v78_v1  ;;  %882 = vmatprep.subr.mxu0 %v1012_v47  ;;  %v721_v48 = vsel %vm628_vm2, %v79_v15, 0.0 }
  0xeb   :  { %v450_v21 = vsel %vm402_vm7, %v96_v43, 0.0  ;;  %vm118_vm3 = vmxor %vm116_vm4, %vm1010_vm11  ;;  %884 = vmatprep.mubr.msk.f32.mxu0 %vm1013_vm9, %v1012_v47  ;;  %722 = vadd.xlane.f32.xlu0 %v721_v48 }
  0xec   :  { %876 = vmatpush3.msra.mxu1 %v450_v21  ;;  %vm120_vm12 = vmand %vm118_vm3, %vm119_vm15 }
  0xed   :  { %vm121_vm14 = vmand %vm115_vm0, %vm120_vm12  ;;  %vm76_vm0 = vcmask 7168  }
  0xee   :  { %807 = vmatprep.mubr.msk.f32.mxu1 %vm121_vm14, %v78_v1  ;;  %77 = vst.msk [vmem:[#allocation2] sm:$0xff] %vm76_vm0, %v1012_v47 }
  0xef   :  { %808 = vmatmul.mubr.msk.f32.vlgmr.msra.gmra.mxu1 %vm121_vm14, %v123_v46 }
  0xf5   :  { %v703_v9 = vld [vmem:[#allocation2] sm:$0xff] }
 0x174   :  { %v723_v57 = vpop.xlane.xlu0 %722 }
 0x175   :  { %vm724_vm11 = vcmp.ne.f32.partialorder %v723_v57, 0.0 }
 0x176   :  { %v725_v58 = vsel %vm724_vm11, 1.0, %v1012_v47 }
 0x177   :  { %v726_v59 = vsel %vm76_vm0, %v725_v58, 0.0 }
 0x178   :  { %727 = vadd.xlane.f32.xlu1 %v726_v59 }
 0x1aa   :  { %v842_v49 = vpop.f32.mrf.mxu0 }
 0x1ac   :  { %v843_v50 = vpop.f32.mrf.mxu0 }
 0x1ad   :  { %v844_v52 = vadd.f32 %v843_v50, %v842_v49 }
 0x1af   :  { %v877_v51 = vpop.f32.mrf.mxu1 }
 0x1b1   :  { %v878_v53 = vpop.f32.mrf.mxu1 }
 0x1b2   :  { %v879_v54 = vadd.f32 %v878_v53, %v877_v51 }
 0x1b4   :  { %v623_v55 = vadd.f32 %v879_v54, %v844_v52 }
 0x1b6   :  { %v626_v56 = vadd.f32 %v623_v55, %v78_v1 }
 0x1b8   :  { %v627_v2 = vmul.f32 0.0625, %v626_v56 }
 0x1ba   :  { %883 = vmatpush3.msra.mxu0 %v627_v2 }
 0x1bb   :  { %885 = vmatmul.mubr.msk.f32.vlgmr.msra.gmra.mxu0 %vm628_vm2, %v79_v15 }
 0x201   :  { %v728_v0 = vpop.xlane.xlu1 %727 }
 0x202   :  { %v729_v3 = vrot.slane %v728_v0, 4 }
 0x204   :  { %v730_v4 = vadd.f32 %v729_v3, %v728_v0 }
 0x206   :  { %v731_v5 = vrot.slane %v730_v4, 2 }
 0x208   :  { %v732_v6 = vadd.f32 %v731_v5, %v730_v4 }
 0x20a   :  { %v733_v7 = vrot.slane %v732_v6, 1 }
 0x20c   :  { %v734_v8 = vadd.f32 %v733_v7, %v732_v6 }
 0x20e   :  { %887 = vpush %v734_v8 }
 0x23f   :  { %s888_s4 = spop %887 }
 0x240   :  { %v748_v24 = vstv %s888_s4  ;;  %p747_p6 = scmp.eq.f32.partialorder %s888_s4, 0.0 }
 0x27b   :  { %v698_v60 = vpop.f32.mrf.mxu0 }
 0x27c   :  { %v702_v61 = vsub.f32 %v78_v1, %v698_v60 }
 0x27d   :  { %v886_v62 = vpop.f32.mrf.mxu0 }
 0x27e   :  { %v704_v63 = vmul.f32 %v702_v61, %v702_v61 }
 0x280   :  { %705 = vadd.xlane.f32.xlu0 %v704_v63 }
 0x309   :  { %v706_v10 = vpop.xlane.xlu0 %705 }
 0x30a   :  { %v707_v11 = vadd.f32 %v706_v10, %v703_v9 }
 0x30c   :  { %709 = vst.msk [vmem:[#allocation2] sm:$0xff] %vm76_vm0, %v707_v11 }
 0x313   :  { %v713_v17 = vld [vmem:[#allocation2] sm:$0xff] }
 0x314   :  { %904 = vrsqrt.f32 %v713_v17  ;;  %vm716_vm6 = vcmp.eq.f32.partialorder %v713_v17, inf  ;;  %v719_v19 = vand.u32 2147483648, %v713_v17  ;;  %vm718_vm8 = vcmp.eq.f32.partialorder %v713_v17, 0.0 }
 0x315   :  { %906 = vrcp.f32 %v748_v24 }
 0x321   :  { %v905_v12 = vpop.eup %904 }
 0x322   :  { %v715_v18 = vmul.f32 %v905_v12, %v713_v17  ;;  %v907_v25 = vpop.eup %906 }
 0x324   :  { %v717_v20 = vsel %vm716_vm6, %v713_v17, %v715_v18 }
 0x325   :  { %v720_v22 = vsel %vm718_vm8, %v719_v19, %v717_v20 }
 0x326   :  { %v736_v13 = vsel %vm724_vm11, %v720_v22, 0.0 }
 0x327   :  { %v737_v23 = vsel %vm76_vm0, %v736_v13, 0.0 }
 0x328   :  { %738 = vadd.xlane.f32.xlu1 %v737_v23 }
 0x3b1   :  { %v739_v26 = vpop.xlane.xlu1 %738 }
 0x3b2   :  { %v740_v27 = vrot.slane %v739_v26, 4 }
 0x3b4   :  { %v741_v14 = vadd.f32 %v740_v27, %v739_v26 }
 0x3b6   :  { %v742_v28 = vrot.slane %v741_v14, 2 }
 0x3b8   :  { %v743_v29 = vadd.f32 %v742_v28, %v741_v14 }
 0x3ba   :  { %v744_v31 = vrot.slane %v743_v29, 1 }
 0x3bc   :  { %v745_v32 = vadd.f32 %v744_v31, %v743_v29 }
 0x3be   :  { %889 = vpush %v745_v32 }
 0x3bf   :  { %891 = vpush %v907_v25 }
 0x3ef   :  { %s890_s13 = spop %889 }
 0x3f0   :  { %s892_s14 = spop %891 }
 0x3f1   :  { %s751_s15 = smul.f32 %s892_s14, %s890_s13 }
 0x3f3   :  { %s1668_s15 = smov (%p747_p6, %s751_s15), 0.0 }
 0x3f4   :  { %754 = sst [smem:[#allocation11]] %s1668_s15 }
 0x3f5   :  { %762 = dma.smem_to_hbm %s1014_s16, 16, %s1622_s5, [#allocation5]  }
 0x3f6   :  { %1002 = dma.done.wait [#allocation5], 16  }
 0x3f7   :  { %1003 = vsyncadd [#allocation5], 4294967280 }
 0x3f8   :  { %766 = sfence }
 0x3f9   :  { %767 = vsyncpa [#allocation4], 1 }
 0x3fa   :  { %768 = vsyncpa [#allocation7], 1 }
 0x3fb   :  { %769 = vsyncpa [#allocation10], 1 }
 0x3fc   :  { %770 = vsyncpa [#allocation5], 1 }

</bundles_post_ra>
